<compile_context>
chip_gen: v7x
topology: tpu7x:2x2x1
jax: 0.10.0
libtpu: 0.0.40
codegen_flags: <defaults>
</compile_context>

<pallas_src>
import numpy as np
import jax
import jax.numpy as jnp
from jax.experimental import pallas as pl
from jax.experimental.pallas import tpu as pltpu

LANES = 128  # head-lane width of all per-head buffers / outputs


def _make_mce_kernel(nf, offsets, B, B_tile, H):
    """Builds the per-batch-tile kernel. nf / offsets / B / H are static."""
    nf = [int(f) for f in nf]
    offsets = [int(o) for o in offsets]
    f32 = jnp.float32

    def kernel(logits_ref, labels_ref, seg_ref, segT_ref, relcol_ref, out_ref):
        g = pl.program_id(0)
        x = logits_ref[...]                                 # (Bt, C1), native dtype
        Bt = x.shape[0]

        lane = jax.lax.broadcasted_iota(jnp.int32, (Bt, LANES), 1)
        row = jax.lax.broadcasted_iota(jnp.int32, (Bt, 1), 0)
        valid = (g * B_tile + row) < B                      # mask padded batch rows

        # --- per-head max into lanes of m_all: one static slice + narrow reduce
        m_all = jnp.zeros((Bt, LANES), f32)
        for hi, f in enumerate(nf):
            off = offsets[hi]
            if f == 1:
                m_h = logits_ref[:, off:off + 1].astype(f32)            # (Bt, 1)
            else:
                m_h = jnp.max(logits_ref[:, off:off + f], axis=-1,
                              keepdims=True).astype(f32)                # (Bt, 1)
            m_all = m_all + jnp.where(lane == hi, m_h, 0.0)

        seg = seg_ref[...]                                  # (C1, 128): column -> head lane
        segT = segT_ref[...]                                # (128, C1): head lane -> columns
        rel_col = relcol_ref[...]                           # (1, C1): class index within head

        def dot(a, b):  # exact/accurate f32 matmuls; MXU is otherwise idle
            return jnp.dot(a, b, preferred_element_type=f32,
                           precision=jax.lax.Precision.HIGHEST)

        # --- one exp pass + MXU segment reductions for ALL heads at once ---
        m_bcast = dot(m_all, segT)                          # (Bt, C1) per-column head max
        z = x.astype(f32) - m_bcast                         # z <= 0 everywhere
        exp_z = jnp.exp(z)                                  # single EUP pass
        sumexp = dot(exp_z, seg)                            # (Bt, 128) per-head sum-exp

        lab_bcast = dot(labels_ref[...].astype(f32), segT)  # (Bt, C1) label id per column
        z_lab_cols = jnp.where(jnp.abs(lab_bcast - rel_col) < 0.5, z, 0.0)
        z_lab = dot(z_lab_cols, seg)                        # (Bt, 128) z at the label column

        nll = jnp.log(sumexp) - z_lab                       # multiclass nll per head lane
        nll = jnp.where(lane < H, nll, 0.0)                 # lanes >= H: log(0) = -inf -> 0

        # --- binary heads: stable BCE-with-logits (tiny, static slices) ----
        for hi, f in enumerate(nf):
            if f != 1:
                continue
            off = offsets[hi]
            x0 = logits_ref[:, off:off + 1].astype(f32)                 # (Bt, 1)
            t = labels_ref[:, hi:hi + 1].astype(f32)                    # (Bt, 1)
            bce = (jnp.maximum(x0, 0.0) - t * x0
                   + jnp.log(1.0 + jnp.exp(-jnp.abs(x0))))
            nll = jnp.where(lane == hi, bce, nll)

        nll = jnp.where(valid, nll, 0.0)
        out_ref[0] = jnp.sum(nll, axis=0, keepdims=True)    # single reduce -> (1, 128)

    return kernel


def multi_cross_entropy(logits, hardlabel, nf, w):
    """Pallas implementation of MultiCrossEntropy.forward (gamma == 0)."""
    nf = [int(f) for f in nf]
    H = len(nf)
    assert H <= LANES, "more than 128 heads not supported by the (., 128) lane layout"
    C1 = int(sum(nf))
    B = int(logits.shape[0])
    assert int(logits.shape[1]) == C1

    offsets = np.concatenate([[0], np.cumsum(nf)[:-1]]).astype(np.int64)
    head_id = np.repeat(np.arange(H), nf)                                # (C1,)

    # static segment matrices / per-column class index (tiny, resident in VMEM)
    seg = np.zeros((C1, LANES), np.float32)
    seg[np.arange(C1), head_id] = 1.0
    segT = np.ascontiguousarray(seg.T)
    rel_col = (np.arange(C1) - offsets[head_id]).astype(np.float32)[None, :]

    # ---- generation-aware tile sizing with honest VMEM accounting --------
    try:
        kind = jax.devices()[0].device_kind.lower()
    except Exception:
        kind = ""
    if "v5" in kind:
        budget, vmem_cap = 6 << 20, 100 << 20       # small tiles; 128 MiB physical
    elif "v7" in kind:
        budget, vmem_cap = 14 << 20, 48 << 20       # only 64 MiB physical VMEM
    else:                                           # v6e / unknown
        budget, vmem_cap = 24 << 20, 96 << 20

    itemsize = logits.dtype.itemsize
    fixed = 2 * (2 * C1 * LANES * 4 + 8 * C1 * 4)   # seg, segT, rel_col (dbl-buffered)
    per_row = (2 * C1 * itemsize                    # logits tile (double-buffered)
               + 2 * LANES * 4                      # labels tile (double-buffered)
               + 6 * C1 * 4                         # in-kernel f32 full-width temps
               + 8 * LANES * 4)                     # (Bt, 128) f32 temps
    row_align = 16 if itemsize == 2 else 8          # bf16 packs 16 rows per sublane group
    B_ceil = -(-B // row_align) * row_align
    avail = max(budget - fixed, 256 * 1024)
    bt = min(avail // per_row, B_ceil)
    bt = max(row_align, (bt // row_align) * row_align)
    if "v7" in kind and bt >= B_ceil and B_ceil >= 2 * row_align:
        # keep >= 2 grid steps so the "parallel" axis shards across both TensorCores
        half = -(-B // 2)
        bt = -(-half // row_align) * row_align
    B_tile = bt
    G = -(-B // B_tile)
    B_pad = G * B_tile

    est_vmem = fixed + B_tile * per_row + (2 << 20)
    vmem_limit = int(min(vmem_cap, max(est_vmem, 32 << 20)))

    labels = jnp.zeros((B_pad, LANES), jnp.int32)
    labels = labels.at[:B, :H].set(hardlabel.astype(jnp.int32))
    if B_pad != B:
        logits = jnp.pad(logits, ((0, B_pad - B), (0, 0)))

    kernel = _make_mce_kernel(nf, offsets, B, B_tile, H)

    cost = pl.CostEstimate(
        flops=int(6 * B_pad * C1 * LANES),
        transcendentals=int(B_pad * (C1 + LANES)),
        bytes_accessed=int(B_pad * C1 * itemsize + B_pad * LANES * 4
                           + 2 * C1 * LANES * 4 + G * LANES * 4))

    partial = pl.pallas_call(
        kernel,
        out_shape=jax.ShapeDtypeStruct((G, 1, LANES), jnp.float32),
        grid_spec=pltpu.PrefetchScalarGridSpec(
            num_scalar_prefetch=0,
            grid=(G,),
            in_specs=[
                pl.BlockSpec((B_tile, C1), lambda g: (g, 0)),     # logits, native dtype
                pl.BlockSpec((B_tile, LANES), lambda g: (g, 0)),  # labels, lane-padded
                pl.BlockSpec((C1, LANES), lambda g: (0, 0)),      # seg   (resident)
                pl.BlockSpec((LANES, C1), lambda g: (0, 0)),      # segT  (resident)
                pl.BlockSpec((1, C1), lambda g: (0, 0)),          # rel_col (resident)
            ],
            out_specs=pl.BlockSpec((1, 1, LANES), lambda g: (g, 0, 0)),
        ),
        compiler_params=pltpu.CompilerParams(
            dimension_semantics=("parallel",),
            vmem_limit_bytes=vmem_limit),
        cost_estimate=cost,
    )(logits, labels, jnp.asarray(seg), jnp.asarray(segT), jnp.asarray(rel_col))

    per_head_sum = jnp.sum(partial[:, 0, :H], axis=0)               # (H,)
    loss = per_head_sum / B
    return jnp.sum(loss * w.astype(jnp.float32))


# --- pure-numpy reference (mirrors the PyTorch forward, gamma=0) -----------
def _ref_mce(logits, hardlabel, nf, w):
    logits = np.asarray(logits, np.float32)
    hardlabel = np.asarray(hardlabel)
    losses = []
    off = 0
    for i, f in enumerate(nf):
        odd = logits[:, off:off + f]
        off += f
        if f == 1:
            p = 1.0 / (1.0 + np.exp(-odd[:, 0]))
            t = hardlabel[:, i].astype(np.float32)
            nll = -(t * np.log(p) + (1.0 - t) * np.log(1.0 - p))
        else:
            m = odd.max(-1, keepdims=True)
            logp = odd - m - np.log(np.exp(odd - m).sum(-1, keepdims=True))
            nll = -logp[np.arange(odd.shape[0]), hardlabel[:, i]]
        losses.append(nll.mean())
    return float((np.array(losses, np.float32) * np.asarray(w, np.float32)).sum())


if __name__ == "__main__":
    key = jax.random.PRNGKey(0)
    nc = (2, 4, 10)                        # class counts per head
    nf = [1 if x == 2 else x for x in nc]  # -> [1, 4, 10]; c1 = 15
    B = 8
    c1 = sum(nf)

    k1, *ks = jax.random.split(key, 1 + len(nc))
    logits = jax.random.normal(k1, (B, c1), jnp.float32)
    hardlabel = jnp.stack(
        [jax.random.randint(ks[i], (B,), 0, nc[i]) for i in range(len(nc))],
        axis=-1).astype(jnp.int32)
    w = jnp.ones((len(nf),), jnp.float32)  # module default: ones, non-trainable

    # f32 logits
    out = multi_cross_entropy(logits, hardlabel, nf, w)
    out = jax.block_until_ready(out)
    ref = _ref_mce(np.asarray(logits), np.asarray(hardlabel), nf, np.asarray(w))
    assert abs(float(out) - ref) < 1e-3 * max(1.0, abs(ref)), (float(out), ref)

    # bf16 logits stay bf16 in HBM; upcast happens inside the kernel at x - m.
    logits_bf16 = logits.astype(jnp.bfloat16)
    out_bf = multi_cross_entropy(logits_bf16, hardlabel, nf, w)
    out_bf = jax.block_until_ready(out_bf)
    ref_bf = _ref_mce(np.asarray(logits_bf16.astype(jnp.float32)),
                      np.asarray(hardlabel), nf, np.asarray(w))
    assert abs(float(out_bf) - ref_bf) < 2e-3 * max(1.0, abs(ref_bf)), (float(out_bf), ref_bf)

    print("KERNEL_OK")
</pallas_src>

<mosaic_0001>
module attributes {stable_mosaic.version = 11 : i64} {
  func.func @kernel(%arg0: i32, %arg1: memref<8x15xf32, #tpu.memory_space<vmem>>, %arg2: memref<8x128xi32, #tpu.memory_space<vmem>>, %arg3: memref<15x128xf32, #tpu.memory_space<vmem>>, %arg4: memref<128x15xf32, #tpu.memory_space<vmem>>, %arg5: memref<1x15xf32, #tpu.memory_space<vmem>>, %arg6: memref<1x1x128xf32, #tpu.memory_space<vmem>>) attributes {dimension_semantics = [#tpu.dimension_semantics<parallel>], iteration_bounds = array<i64: 1>, scalar_prefetch = 0 : i64, scratch_operands = 0 : i64, tpu.core_type = #tpu.core_type<tc>, window_params = [{transform_indices = @transform_0, window_bounds = array<i64: 8, 15>}, {transform_indices = @transform_1, window_bounds = array<i64: 8, 128>}, {pipeline_mode = #tpu.pipeline_mode<synchronous>, transform_indices = @transform_2, window_bounds = array<i64: 15, 128>}, {pipeline_mode = #tpu.pipeline_mode<synchronous>, transform_indices = @transform_3, window_bounds = array<i64: 128, 15>}, {pipeline_mode = #tpu.pipeline_mode<synchronous>, transform_indices = @transform_4, window_bounds = array<i64: 1, 15>}, {transform_indices = @transform_5, window_bounds = array<i64: 1, 1, 128>}]} {
    %c0 = arith.constant 0 : index
    %c0_0 = arith.constant 0 : index
    %0 = vector.load %arg1[%c0, %c0_0] : memref<8x15xf32, #tpu.memory_space<vmem>>, vector<8x15xf32>
    %1 = tpu.iota {dimensions = array<i32: 1>} : vector<8x128xi32>
    %2 = tpu.iota {dimensions = array<i32: 0>} : vector<8x1xi32>
    %c8_i32 = arith.constant 8 : i32
    %3 = arith.muli %arg0, %c8_i32 : i32
    %4 = vector.broadcast %3 : i32 to vector<8x1xi32>
    %5 = arith.addi %4, %2 : vector<8x1xi32>
    %c8_i32_1 = arith.constant 8 : i32
    %6 = vector.broadcast %c8_i32_1 : i32 to vector<8x1xi32>
    %7 = arith.cmpi slt, %5, %6 : vector<8x1xi32>
    %cst = arith.constant 0.000000e+00 : f32
    %8 = vector.broadcast %cst : f32 to vector<8x128xf32>
    %c0_2 = arith.constant 0 : index
    %c0_3 = arith.constant 0 : index
    %9 = vector.load %arg1[%c0_2, %c0_3] : memref<8x15xf32, #tpu.memory_space<vmem>>, vector<8x1xf32>
    %c0_i32 = arith.constant 0 : i32
    %10 = vector.broadcast %c0_i32 : i32 to vector<8x128xi32>
    %11 = arith.cmpi eq, %1, %10 : vector<8x128xi32>
    %cst_4 = arith.constant 0.000000e+00 : f32
    %12 = vector.shape_cast %9 : vector<8x1xf32> to vector<8x1xf32>
    %13 = vector.broadcast %12 : vector<8x1xf32> to vector<8x128xf32>
    %14 = vector.broadcast %cst_4 : f32 to vector<8x128xf32>
    %15 = arith.select %11, %13, %14 : vector<8x128xi1>, vector<8x128xf32>
    %16 = arith.addf %8, %15 : vector<8x128xf32>
    %c0_5 = arith.constant 0 : index
    %c1 = arith.constant 1 : index
    %17 = vector.load %arg1[%c0_5, %c1] : memref<8x15xf32, #tpu.memory_space<vmem>>, vector<8x4xf32>
    %cst_6 = arith.constant dense<0xFF800000> : vector<8xf32>
    %18 = vector.multi_reduction <maximumf>, %17, %cst_6 [1] : vector<8x4xf32> to vector<8xf32>
    %19 = vector.shape_cast %18 : vector<8xf32> to vector<8x1xf32>
    %c1_i32 = arith.constant 1 : i32
    %20 = vector.broadcast %c1_i32 : i32 to vector<8x128xi32>
    %21 = arith.cmpi eq, %1, %20 : vector<8x128xi32>
    %cst_7 = arith.constant 0.000000e+00 : f32
    %22 = vector.shape_cast %19 : vector<8x1xf32> to vector<8x1xf32>
    %23 = vector.broadcast %22 : vector<8x1xf32> to vector<8x128xf32>
    %24 = vector.broadcast %cst_7 : f32 to vector<8x128xf32>
    %25 = arith.select %21, %23, %24 : vector<8x128xi1>, vector<8x128xf32>
    %26 = arith.addf %16, %25 : vector<8x128xf32>
    %c0_8 = arith.constant 0 : index
    %c5 = arith.constant 5 : index
    %27 = vector.load %arg1[%c0_8, %c5] : memref<8x15xf32, #tpu.memory_space<vmem>>, vector<8x10xf32>
    %cst_9 = arith.constant dense<0xFF800000> : vector<8xf32>
    %28 = vector.multi_reduction <maximumf>, %27, %cst_9 [1] : vector<8x10xf32> to vector<8xf32>
    %29 = vector.shape_cast %28 : vector<8xf32> to vector<8x1xf32>
    %c2_i32 = arith.constant 2 : i32
    %30 = vector.broadcast %c2_i32 : i32 to vector<8x128xi32>
    %31 = arith.cmpi eq, %1, %30 : vector<8x128xi32>
    %cst_10 = arith.constant 0.000000e+00 : f32
    %32 = vector.shape_cast %29 : vector<8x1xf32> to vector<8x1xf32>
    %33 = vector.broadcast %32 : vector<8x1xf32> to vector<8x128xf32>
    %34 = vector.broadcast %cst_10 : f32 to vector<8x128xf32>
    %35 = arith.select %31, %33, %34 : vector<8x128xi1>, vector<8x128xf32>
    %36 = arith.addf %26, %35 : vector<8x128xf32>
    %c0_11 = arith.constant 0 : index
    %c0_12 = arith.constant 0 : index
    %37 = vector.load %arg3[%c0_11, %c0_12] : memref<15x128xf32, #tpu.memory_space<vmem>>, vector<15x128xf32>
    %c0_13 = arith.constant 0 : index
    %c0_14 = arith.constant 0 : index
    %38 = vector.load %arg4[%c0_13, %c0_14] : memref<128x15xf32, #tpu.memory_space<vmem>>, vector<128x15xf32>
    %c0_15 = arith.constant 0 : index
    %c0_16 = arith.constant 0 : index
    %39 = vector.load %arg5[%c0_15, %c0_16] : memref<1x15xf32, #tpu.memory_space<vmem>>, vector<1x15xf32>
    %cst_17 = arith.constant dense<0.000000e+00> : vector<8x15xf32>
    %40 = tpu.matmul %36, %38, %cst_17 {dimension_numbers = #tpu.dot_dimension_numbers<[1], [0], [0], [1], [0, 0, 1, 1], [], []>, precision = #tpu.contract_precision<fp32>} : vector<8x128xf32>, vector<128x15xf32>, vector<8x15xf32> -> vector<8x15xf32>
    %41 = arith.subf %0, %40 : vector<8x15xf32>
    %42 = math.exp %41 : vector<8x15xf32>
    %cst_18 = arith.constant dense<0.000000e+00> : vector<8x128xf32>
    %43 = tpu.matmul %42, %37, %cst_18 {dimension_numbers = #tpu.dot_dimension_numbers<[1], [0], [0], [1], [0, 0, 1, 1], [], []>, precision = #tpu.contract_precision<fp32>} : vector<8x15xf32>, vector<15x128xf32>, vector<8x128xf32> -> vector<8x128xf32>
    %c0_19 = arith.constant 0 : index
    %c0_20 = arith.constant 0 : index
    %44 = vector.load %arg2[%c0_19, %c0_20] : memref<8x128xi32, #tpu.memory_space<vmem>>, vector<8x128xi32>
    %45 = arith.sitofp %44 : vector<8x128xi32> to vector<8x128xf32>
    %cst_21 = arith.constant dense<0.000000e+00> : vector<8x15xf32>
    %46 = tpu.matmul %45, %38, %cst_21 {dimension_numbers = #tpu.dot_dimension_numbers<[1], [0], [0], [1], [0, 0, 1, 1], [], []>, precision = #tpu.contract_precision<fp32>} : vector<8x128xf32>, vector<128x15xf32>, vector<8x15xf32> -> vector<8x15xf32>
    %47 = vector.broadcast %39 : vector<1x15xf32> to vector<8x15xf32>
    %48 = arith.subf %46, %47 : vector<8x15xf32>
    %49 = math.absf %48 : vector<8x15xf32>
    %cst_22 = arith.constant 5.000000e-01 : f32
    %50 = vector.broadcast %cst_22 : f32 to vector<8x15xf32>
    %51 = arith.cmpf olt, %49, %50 : vector<8x15xf32>
    %cst_23 = arith.constant 0.000000e+00 : f32
    %52 = vector.broadcast %cst_23 : f32 to vector<8x15xf32>
    %53 = arith.select %51, %41, %52 : vector<8x15xi1>, vector<8x15xf32>
    %cst_24 = arith.constant dense<0.000000e+00> : vector<8x128xf32>
    %54 = tpu.matmul %53, %37, %cst_24 {dimension_numbers = #tpu.dot_dimension_numbers<[1], [0], [0], [1], [0, 0, 1, 1], [], []>, precision = #tpu.contract_precision<fp32>} : vector<8x15xf32>, vector<15x128xf32>, vector<8x128xf32> -> vector<8x128xf32>
    %55 = math.log %43 : vector<8x128xf32>
    %56 = arith.subf %55, %54 : vector<8x128xf32>
    %c3_i32 = arith.constant 3 : i32
    %57 = vector.broadcast %c3_i32 : i32 to vector<8x128xi32>
    %58 = arith.cmpi slt, %1, %57 : vector<8x128xi32>
    %cst_25 = arith.constant 0.000000e+00 : f32
    %59 = vector.broadcast %cst_25 : f32 to vector<8x128xf32>
    %60 = arith.select %58, %56, %59 : vector<8x128xi1>, vector<8x128xf32>
    %c0_26 = arith.constant 0 : index
    %c0_27 = arith.constant 0 : index
    %61 = vector.load %arg1[%c0_26, %c0_27] : memref<8x15xf32, #tpu.memory_space<vmem>>, vector<8x1xf32>
    %c0_28 = arith.constant 0 : index
    %c0_29 = arith.constant 0 : index
    %62 = vector.load %arg2[%c0_28, %c0_29] : memref<8x128xi32, #tpu.memory_space<vmem>>, vector<8x1xi32>
    %63 = arith.sitofp %62 : vector<8x1xi32> to vector<8x1xf32>
    %cst_30 = arith.constant 0.000000e+00 : f32
    %64 = vector.broadcast %cst_30 : f32 to vector<8x1xf32>
    %65 = arith.maximumf %61, %64 : vector<8x1xf32>
    %66 = arith.mulf %63, %61 : vector<8x1xf32>
    %67 = arith.subf %65, %66 : vector<8x1xf32>
    %68 = math.absf %61 : vector<8x1xf32>
    %cst_31 = arith.constant 0.000000e+00 : f32
    %69 = vector.broadcast %cst_31 : f32 to vector<8x1xf32>
    %70 = arith.subf %69, %68 : vector<8x1xf32>
    %71 = math.exp %70 : vector<8x1xf32>
    %cst_32 = arith.constant 1.000000e+00 : f32
    %72 = vector.broadcast %cst_32 : f32 to vector<8x1xf32>
    %73 = arith.addf %72, %71 : vector<8x1xf32>
    %74 = math.log %73 : vector<8x1xf32>
    %75 = arith.addf %67, %74 : vector<8x1xf32>
    %c0_i32_33 = arith.constant 0 : i32
    %76 = vector.broadcast %c0_i32_33 : i32 to vector<8x128xi32>
    %77 = arith.cmpi eq, %1, %76 : vector<8x128xi32>
    %78 = vector.shape_cast %75 : vector<8x1xf32> to vector<8x1xf32>
    %79 = vector.broadcast %78 : vector<8x1xf32> to vector<8x128xf32>
    %80 = arith.select %77, %79, %60 : vector<8x128xi1>, vector<8x128xf32>
    %cst_34 = arith.constant 0.000000e+00 : f32
    %81 = vector.shape_cast %7 : vector<8x1xi1> to vector<8x1xi1>
    %82 = vector.broadcast %81 : vector<8x1xi1> to vector<8x128xi1>
    %83 = vector.broadcast %cst_34 : f32 to vector<8x128xf32>
    %84 = arith.select %82, %80, %83 : vector<8x128xi1>, vector<8x128xf32>
    %cst_35 = arith.constant dense<0.000000e+00> : vector<128xf32>
    %85 = vector.multi_reduction <add>, %84, %cst_35 [0] : vector<8x128xf32> to vector<128xf32>
    %86 = vector.shape_cast %85 : vector<128xf32> to vector<1x128xf32>
    %c0_36 = arith.constant 0 : index
    %c0_37 = arith.constant 0 : index
    %c0_38 = arith.constant 0 : index
    %87 = vector.load %arg6[%c0_36, %c0_37, %c0_38] : memref<1x1x128xf32, #tpu.memory_space<vmem>>, vector<1x1x128xf32>
    %88 = vector.shape_cast %87 : vector<1x1x128xf32> to vector<1x128xf32>
    %89 = vector.shape_cast %86 : vector<1x128xf32> to vector<1x1x128xf32>
    tpu.vector_store %arg6[%c0_36, %c0_37, %c0_38], %89 {strides = array<i32>} : memref<1x1x128xf32, #tpu.memory_space<vmem>>, vector<1x1x128xf32>,
    return
  }
  func.func @transform_0(%arg0: i32) -> (i32, i32) {
    %c0_i32 = arith.constant 0 : i32
    %c0_i32_0 = arith.constant 0 : i32
    return %arg0, %c0_i32 : i32, i32
  }
  func.func @transform_1(%arg0: i32) -> (i32, i32) {
    %c0_i32 = arith.constant 0 : i32
    %c0_i32_0 = arith.constant 0 : i32
    return %arg0, %c0_i32 : i32, i32
  }
  func.func @transform_2(%arg0: i32) -> (i32, i32) {
    %c0_i32 = arith.constant 0 : i32
    %c0_i32_0 = arith.constant 0 : i32
    %c0_i32_1 = arith.constant 0 : i32
    return %c0_i32, %c0_i32_0 : i32, i32
  }
  func.func @transform_3(%arg0: i32) -> (i32, i32) {
    %c0_i32 = arith.constant 0 : i32
    %c0_i32_0 = arith.constant 0 : i32
    %c0_i32_1 = arith.constant 0 : i32
    return %c0_i32, %c0_i32_0 : i32, i32
  }
  func.func @transform_4(%arg0: i32) -> (i32, i32) {
    %c0_i32 = arith.constant 0 : i32
    %c0_i32_0 = arith.constant 0 : i32
    %c0_i32_1 = arith.constant 0 : i32
    return %c0_i32, %c0_i32_0 : i32, i32
  }
  func.func @transform_5(%arg0: i32) -> (i32, i32, i32) {
    %c0_i32 = arith.constant 0 : i32
    %c0_i32_0 = arith.constant 0 : i32
    %c0_i32_1 = arith.constant 0 : i32
    return %arg0, %c0_i32, %c0_i32_0 : i32, i32, i32
  }
}

</mosaic_0001>

<bundles_post_ra>
// kernel: tpu_custom_call.1
= control target key start
LH: loop header
LB: loop body
LE: loop exit
PB: predicated region body
PF: predicated region fallthrough
CT: control target
= control target key end

     0   :  { %vm38_vm0 = vcmask 39944   ;;  %vm45_vm1 = vcmask 121896   ;;  %v3491_v2 = vmov 0   ;;  %v3492_v3 = vmov 0.0|0.0   ;;  %s4241_s0 = inlined_call_operand.vmem [shape: f32[8,15], index: 0, kind: input, shape index: {}]   ;;  %s4242_s1 = inlined_call_operand.vmem [shape: s32[8,128], index: 1, kind: input, shape index: {}]   ;;  %s4243_s2 = inlined_call_operand.vmem [shape: f32[15,128], index: 2, kind: input, shape index: {}]   ;;  %s4244_s3 = inlined_call_operand.vmem [shape: f32[128,15], index: 3, kind: input, shape index: {}]   ;;  %s4245_s4 = inlined_call_operand.vmem [shape: f32[1,15], index: 4, kind: input, shape index: {}]   ;;  %s4246_s5 = inlined_call_operand.hbm [shape: f32[1,1,128], index: 5, kind: output, shape index: {}]  }
   0x1   :  { %v3529_v0 = vld [vmem:[%s4241_s0] sm:$0xff]  ;;  %3457 = vset.pattern.permute.xlu1 %v3491_v2  ;;  %3088 = vmatprep.subr.bf16.mxu0 %v3492_v3  ;;  %v55_v5 = vld [vmem:[%s4244_s3 + $0x8] sm:$0xff]  ;;  %v3542_v6 = vld [vmem:[%s4244_s3 + $0x10] sm:$0xff] }
   0x2   :  { %v39_v1 = vsel %vm38_vm0, %v3529_v0, -inf  ;;  %v54_v4 = vld [vmem:[%s4244_s3] sm:$0xff]  ;;  %33 = vperm.xlu1 %3457, %v3529_v0   ;;  %v2305_v7 = vand.u32 2147483647, %v3529_v0  ;;  %v75_v9 = vand.u32 4294901760, %v55_v5  ;;  %v3549_v10 = vld [vmem:[%s4244_s3 + $0x18] sm:$0xff]  ;;  %3232 = vmatprep.subr.bf16.mxu1 %v3492_v3 }
   0x3   :  { %40 = vmax.xlane.f32.xlu0 %v39_v1  ;;  %v72_v8 = vand.u32 4294901760, %v54_v4  ;;  %v78_v11 = vand.u32 4294901760, %v3542_v6  ;;  %v46_v12 = vsel %vm45_vm1, %v3529_v0, -inf  ;;  %v81_v13 = vand.u32 4294901760, %v3549_v10  ;;  %v3558_v14 = vld [vmem:[%s4244_s3 + $0x20] sm:$0xff]  ;;  %v3563_v15 = vld [vmem:[%s4244_s3 + $0x28] sm:$0xff] }
   0x4   :  { %3458 = vset.pattern.permute.xlu0 %v3491_v2  ;;  %v2306_v16 = vsub.f32 0.0, %v2305_v7 }
   0x5   :  { %v3566_v17 = vpack.c.bf16 %v75_v9, %v72_v8 }
   0x6   :  { %10 = vsyncpa [#allocation3], 0  ;;  %v2307_v18 = vmul.f32 1.442695, %v2306_v16  ;;  %v3573_v19 = vpack.c.bf16 %v81_v13, %v78_v11  ;;  %v84_v20 = vand.u32 4294901760, %v3558_v14  ;;  %v87_v21 = vand.u32 4294901760, %v3563_v15 }
   0x7   :  { %47 = vmax.xlane.f32.xlu0 %v46_v12  ;;  %3090 = vmatpush3.bf16.msra.mxu0 %v3566_v17  ;;  %v3581_v22 = vld [vmem:[%s4244_s3 + $0x30] sm:$0xff]  ;;  %v3586_v23 = vld [vmem:[%s4244_s3 + $0x38] sm:$0xff]  ;;  %v3601_v27 = vld [vmem:[%s4244_s3 + $0x40] sm:$0xff]  ;;  %v2302_v46 = vmax.f32 %v3529_v0, 0.0  ;;  %v3664_v47 = vsub.f32 %v54_v4, %v72_v8  ;;  %v3666_v48 = vsub.f32 %v55_v5, %v75_v9  ;;  %vm3493_vm2 = vmmov 0  }
   0x8   :  { %3091 = vmatprep.subr.bf16.mxu0 %v3492_v3  ;;  %3459 = vpow2.f32 %v2307_v18  ;;  %v3593_v24 = vpack.c.bf16 %v87_v21, %v84_v20  ;;  %v90_v25 = vand.u32 4294901760, %v3581_v22  ;;  %v93_v26 = vand.u32 4294901760, %v3586_v23  ;;  %v3606_v28 = vld [vmem:[%s4244_s3 + $0x48] sm:$0xff]  ;;  %v3621_v32 = vld [vmem:[%s4244_s3 + $0x50] sm:$0xff]  ;;  %v3626_v33 = vld [vmem:[%s4244_s3 + $0x58] sm:$0xff] }
   0x9   :  { %v96_v30 = vand.u32 4294901760, %v3601_v27  ;;  %v99_v31 = vand.u32 4294901760, %v3606_v28  ;;  %v1182_v35 = vld [vmem:[%s4242_s1] sm:$0xff]  ;;  %v102_v37 = vand.u32 4294901760, %v3621_v32  ;;  %v105_v38 = vand.u32 4294901760, %v3626_v33  ;;  %v3651_v42 = vld [vmem:[%s4244_s3 + $0x68] sm:$0xff] }
   0xa   :  { %v3613_v29 = vpack.c.bf16 %v93_v26, %v90_v25  ;;  %v3641_v40 = vcvt.s32.f32 %v1182_v35  ;;  %v3646_v41 = vld [vmem:[%s4244_s3 + $0x60] sm:$0xff]  ;;  %v111_v45 = vand.u32 4294901760, %v3651_v42  ;;  %v3679_v51 = vld [vmem:[%s4244_s3 + $0x70] sm:$0xff]  ;;  %v3684_v52 = vld [vmem:[%s4244_s3 + $0x78] sm:$0xff]  ;;  %v3494_v55 = vmov 0.0  }
   0xb   :  { %3093 = vmatpush3.bf16.msra.mxu0 %v3573_v19  ;;  %v3636_v36 = vpack.c.bf16 %v99_v31, %v96_v30  ;;  %v3658_v43 = vpack.c.bf16 %v105_v38, %v102_v37  ;;  %v108_v44 = vand.u32 4294901760, %v3646_v41  ;;  %v114_v53 = vand.u32 4294901760, %v3679_v51  ;;  %2616 = vmatprep.mubr.msk.f32.mxu0 %vm3493_vm2, %v3494_v55 }
   0xc   :  { %3094 = vmatprep.subr.bf16.mxu0 %v3492_v3  ;;  %v2303_v49 = vmul.f32 %v3641_v40, %v3529_v0  ;;  %v117_v54 = vand.u32 4294901760, %v3684_v52  ;;  %v165_v56 = vand.u32 4294901760, %v3664_v47  ;;  %v172_v57 = vand.u32 4294901760, %v3666_v48  ;;  %2798 = vmatprep.mubr.msk.f32.mxu1 %vm3493_vm2, %v3494_v55 }
   0xd   :  { %v3674_v50 = vpack.c.bf16 %v111_v45, %v108_v44  ;;  %v3705_v60 = vsub.f32 %v3542_v6, %v78_v11  ;;  %v3710_v62 = vsub.f32 %v3549_v10, %v81_v13  ;;  %v3730_v10 = vsub.f32 %v3558_v14, %v84_v20 }
   0xe   :  { %v166_v58 = vsub.f32 %v3664_v47, %v165_v56  ;;  %v173_v59 = vsub.f32 %v3666_v48, %v172_v57  ;;  %v2304_v61 = vsub.f32 %v2302_v46, %v2303_v49  ;;  %v3717_v63 = vpack.c.bf16 %v117_v54, %v114_v53 }
   0xf   :  { %3096 = vmatpush3.bf16.msra.mxu0 %v3593_v24  ;;  %v179_v4 = vand.u32 4294901760, %v3705_v60  ;;  %v186_v6 = vand.u32 4294901760, %v3710_v62  ;;  %v3738_v12 = vsub.f32 %v3563_v15, %v87_v21  ;;  %v193_v18 = vand.u32 4294901760, %v3730_v10 }
  0x10   :  { %3097 = vmatprep.subr.bf16.mxu0 %v3492_v3  ;;  %v167_v1 = vand.u32 4294901760, %v166_v58  ;;  %v174_v2 = vand.u32 4294901760, %v173_v59  ;;  %v3750_v15 = vsub.f32 %v3581_v22, %v90_v25  ;;  %v3755_v21 = vsub.f32 %v3586_v23, %v93_v26 }
  0x11   :  { %v180_v9 = vsub.f32 %v3705_v60, %v179_v4  ;;  %v187_v11 = vsub.f32 %v3710_v62, %v186_v6  ;;  %v200_v14 = vand.u32 4294901760, %v3738_v12  ;;  %v194_v20 = vsub.f32 %v3730_v10, %v193_v18 }
  0x12   :  { %v3460_v34 = vpop.eup %3459  ;;  %v3722_v8 = vpack.c.bf16 %v174_v2, %v167_v1  ;;  %v4256_v49 = vand.u32 4294901760, %v3750_v15  ;;  %v4255_v58 = vand.u32 4294901760, %v3755_v21  ;;  %v3773_v25 = vsub.f32 %v3601_v27, %v96_v30 }
  0x13   :  { %3099 = vmatpush3.bf16.msra.mxu0 %v3613_v29  ;;  %v2309_v39 = vadd.f32 1.0, %v3460_v34  ;;  %v181_v16 = vand.u32 4294901760, %v180_v9  ;;  %v188_v34 = vand.u32 4294901760, %v187_v11  ;;  %v195_v46 = vand.u32 4294901760, %v194_v20 }
  0x14   :  { %3100 = vmatprep.subr.bf16.mxu0 %v3492_v3  ;;  %v208_v22 = vsub.f32 %v3750_v15, %v4256_v49  ;;  %v215_v23 = vsub.f32 %v3755_v21, %v4255_v58  ;;  %v3778_v26 = vsub.f32 %v3606_v28, %v99_v31  ;;  %v3795_v28 = vsub.f32 %v3621_v32, %v102_v37 }
  0x15   :  { %3461 = vlog2.f32 %v2309_v39  ;;  %v3757_v35 = vpack.c.bf16 %v188_v34, %v181_v16  ;;  %v201_v39 = vsub.f32 %v3738_v12, %v200_v14  ;;  %v3800_v31 = vsub.f32 %v3626_v33, %v105_v38 }
  0x16   :  { %v209_v1 = vand.u32 4294901760, %v208_v22  ;;  %v216_v2 = vand.u32 4294901760, %v215_v23  ;;  %v4252_v16 = vand.u32 4294901760, %v3795_v28  ;;  %v3812_v32 = vsub.f32 %v3646_v41, %v108_v44 }
  0x17   :  { %3102 = vmatpush3.bf16.msra.mxu0 %v3636_v36  ;;  %v202_v59 = vand.u32 4294901760, %v201_v39  ;;  %v4251_v34 = vand.u32 4294901760, %v3800_v31  ;;  %v3817_v33 = vsub.f32 %v3651_v42, %v111_v45  ;;  %v3833_v42 = vsub.f32 %v3679_v51, %v114_v53 }
  0x18   :  { %3103 = vmatprep.subr.bf16.mxu0 %v3492_v3  ;;  %v3784_v9 = vpack.c.bf16 %v216_v2, %v209_v1  ;;  %v236_v39 = vsub.f32 %v3795_v28, %v4252_v16  ;;  %v3838_v45 = vsub.f32 %v3684_v52, %v117_v54  ;;  %vm719_vm6 = vcmask 1046528  }
  0x19   :  { %v243_v37 = vsub.f32 %v3800_v31, %v4251_v34  ;;  %vm715_vm7 = vcmask 121856  }
  0x1a   :  { %v237_v38 = vand.u32 4294901760, %v236_v39  ;;  %v3856_v39 = vpack.c.bf16 %v3666_v48, %v3664_v47  ;;  %v3972_v47 = vpack.c.bf16 %v200_v14, %v193_v18  ;;  %v4257_v48 = vand.u32 4294901760, %v3750_v15 }
  0x1b   :  { %3105 = vmatpush3.bf16.msra.mxu0 %v3658_v43  ;;  %v244_v22 = vand.u32 4294901760, %v243_v37  ;;  %v3860_v37 = vpack.c.bf16 %v3710_v62, %v3705_v60  ;;  %v4259_v60 = vand.u32 4294901760, %v3773_v25  ;;  %v4260_v62 = vand.u32 4294901760, %v3778_v26 }
  0x1c   :  { %3106 = vmatprep.subr.bf16.mxu0 %v3492_v3  ;;  %v4263_v18 = vand.u32 4294901760, %v3812_v32  ;;  %v4264_v14 = vand.u32 4294901760, %v3817_v33 }
  0x1d   :  { %v3840_v23 = vpack.c.bf16 %v244_v22, %v237_v38  ;;  %v3864_v38 = vpack.c.bf16 %v3738_v12, %v3730_v10  ;;  %v3868_v22 = vpack.c.bf16 %v3755_v21, %v3750_v15  ;;  %v4262_v10 = vand.u32 4294901760, %v3800_v31 }
  0x1e   :  { %v4004_v15 = vpack.c.bf16 %v4264_v14, %v4263_v18 }
  0x1f   :  { %3108 = vmatpush3.bf16.msra.mxu0 %v3674_v50  ;;  %v3462_v5 = vpop.eup %3461 }
  0x20   :  { %3109 = vmatprep.subr.bf16.mxu0 %v3492_v3  ;;  %v2311_v7 = vmul.f32 0.6931472, %v3462_v5  ;;  %v4254_v5 = vand.u32 4294901760, %v3773_v25 }
  0x22   :  { %v2312_v13 = vadd.f32 %v2311_v7, %v2304_v61  ;;  %v3780_v61 = vpack.c.bf16 %v202_v59, %v195_v46  ;;  %v4253_v7 = vand.u32 4294901760, %v3778_v26  ;;  %v222_v27 = vsub.f32 %v3773_v25, %v4254_v5 }
  0x23   :  { %3111 = vmatpush3.bf16.msra.mxu0 %v3717_v63  ;;  %v4250_v46 = vand.u32 4294901760, %v3812_v32  ;;  %v4249_v59 = vand.u32 4294901760, %v3817_v33 }
  0x24   :  { %3112 = vmatprep.subr.bf16.mxu0 %v3492_v3  ;;  %2315 = vperm.xlu1 %3457, %v2312_v13   ;;  %v229_v30 = vsub.f32 %v3778_v26, %v4253_v7  ;;  %v223_v11 = vand.u32 4294901760, %v222_v27  ;;  %v4248_v27 = vand.u32 4294901760, %v3833_v42 }
  0x25   :  { %v250_v41 = vsub.f32 %v3812_v32, %v4250_v46  ;;  %v257_v44 = vsub.f32 %v3817_v33, %v4249_v59 }
  0x26   :  { %v230_v13 = vand.u32 4294901760, %v229_v30  ;;  %v4247_v30 = vand.u32 4294901760, %v3838_v45  ;;  %v264_v51 = vsub.f32 %v3833_v42, %v4248_v27 }
  0x27   :  { %v251_v1 = vand.u32 4294901760, %v250_v41  ;;  %v258_v2 = vand.u32 4294901760, %v257_v44  ;;  %v3872_v41 = vpack.c.bf16 %v3778_v26, %v3773_v25  ;;  %v3876_v44 = vpack.c.bf16 %v3800_v31, %v3795_v28 }
  0x28   :  { %v3804_v20 = vpack.c.bf16 %v230_v13, %v223_v11  ;;  %v271_v53 = vsub.f32 %v3838_v45, %v4247_v30  ;;  %v265_v52 = vand.u32 4294901760, %v264_v51  ;;  %v22_v51 = vlaneseq }
  0x29   :  { %v3844_v11 = vpack.c.bf16 %v258_v2, %v251_v1  ;;  %v3880_v1 = vpack.c.bf16 %v3817_v33, %v3812_v32  ;;  %v3884_v2 = vpack.c.bf16 %v3838_v45, %v3833_v42  ;;  %v4266_v25 = vand.u32 4294901760, %v3838_v45 }
  0x2a   :  { %v272_v54 = vand.u32 4294901760, %v271_v53  ;;  %v3886_v53 = vand.u32 127, %v22_v51 }
  0x2c   :  { %v3852_v13 = vpack.c.bf16 %v272_v54, %v265_v52  ;;  %vm30_vm3 = vcmp.eq.s32.totalorder %v3886_v53, 0  ;;  %vm42_vm4 = vcmp.eq.s32.totalorder %v3886_v53, 1  ;;  %vm49_vm5 = vcmp.eq.s32.totalorder %v3886_v53, 2 }
  0x2d   :  { %vm2300_vm9 = vcmp.lt.s32.totalorder %v3886_v53, 3 }
  0x81   :  { %v34_v52 = vpop.permute.xlu1 %33 }
  0x82   :  { %v36_v30 = vsel %vm30_vm3, %v34_v52, 0.0 }
  0x90   :  { %v41_v54 = vpop.xlane.xlu0 %40 }
  0x91   :  { %v43_v27 = vsel %vm42_vm4, %v41_v54, 0.0 }
  0x92   :  { %v44_v59 = vadd.f32 %v43_v27, %v36_v30 }
  0x94   :  { %v48_v46 = vpop.xlane.xlu0 %47 }
  0x95   :  { %v50_v34 = vsel %vm49_vm5, %v48_v46, 0.0 }
  0x96   :  { %v51_v16 = vadd.f32 %v50_v34, %v44_v59 }
  0x98   :  { %v3893_v7 = vand.u32 4294901760, %v51_v16 }
  0x9a   :  { %v153_v51 = vsub.f32 %v51_v16, %v3893_v7 }
  0x9c   :  { %v154_v5 = vand.u32 4294901760, %v153_v51 }
  0x9e   :  { %v155_v58 = vsub.f32 %v153_v51, %v154_v5 }
  0xa0   :  { %v156_v49 = vand.u32 4294901760, %v155_v58  ;;  %v3962_v58 = vpack.c.bf16 %v186_v6, %v179_v4  ;;  %v3988_v4 = vpack.c.bf16 %v4260_v62, %v4259_v60  ;;  %v4261_v6 = vand.u32 4294901760, %v3795_v28  ;;  %v53_v28 = vld [vmem:[%s4243_s2 + $0x8] sm:$0x7f] }
  0xa1   :  { %v721_v31 = vsel %vm719_vm6, %v53_v28, 0 }
  0xa2   :  { %2617 = vmatmul.mubr.f32.vlgmr.msra.gmra.mrb[0].mxu0 %v156_v49  ;;  %v3954_v49 = vpack.c.bf16 %v172_v57, %v165_v56  ;;  %v4258_v56 = vand.u32 4294901760, %v3755_v21  ;;  %v3996_v12 = vpack.c.bf16 %v4262_v10, %v4261_v6  ;;  %v4265_v21 = vand.u32 4294901760, %v3833_v42 }
  0xa3   :  { %3114 = vmatpush3.bf16.msra.mxu0 %v3722_v8  ;;  %2651 = vmatprep.mubr.msk.f32.mxu0 %vm3493_vm2, %v3494_v55  ;;  %v727_v34 = vand.u32 4294901760, %v721_v31 }
  0xa4   :  { %3115 = vmatprep.subr.bf16.mxu0 %v3492_v3  ;;  %v3980_v57 = vpack.c.bf16 %v4258_v56, %v4257_v48  ;;  %v4012_v26 = vpack.c.bf16 %v4266_v25, %v4265_v21 }
  0xa5   :  { %v809_v33 = vsub.f32 %v721_v31, %v727_v34 }
  0xa7   :  { %3117 = vmatpush3.bf16.msra.mxu0 %v3757_v35  ;;  %v810_v59 = vand.u32 4294901760, %v809_v33 }
  0xa8   :  { %3118 = vmatprep.subr.bf16.mxu0 %v3492_v3 }
  0xa9   :  { %v811_v45 = vsub.f32 %v809_v33, %v810_v59 }
  0xab   :  { %3120 = vmatpush3.bf16.msra.mxu0 %v3780_v61  ;;  %v812_v30 = vand.u32 4294901760, %v811_v45 }
  0xac   :  { %3121 = vmatprep.subr.bf16.mxu0 %v3492_v3 }
  0xaf   :  { %3123 = vmatpush3.bf16.msra.mxu0 %v3784_v9 }
  0xb0   :  { %3124 = vmatprep.subr.bf16.mxu0 %v3492_v3 }
  0xb3   :  { %3126 = vmatpush3.bf16.msra.mxu0 %v3804_v20 }
  0xb4   :  { %3127 = vmatprep.subr.bf16.mxu0 %v3492_v3 }
  0xb7   :  { %3129 = vmatpush3.bf16.msra.mxu0 %v3840_v23 }
  0xb8   :  { %3130 = vmatprep.subr.bf16.mxu0 %v3492_v3 }
  0xbb   :  { %3132 = vmatpush3.bf16.msra.mxu0 %v3844_v11 }
  0xbc   :  { %3133 = vmatprep.subr.bf16.mxu0 %v3492_v3 }
  0xbf   :  { %3135 = vmatpush3.bf16.msra.mxu0 %v3852_v13 }
  0xc0   :  { %3136 = vmatprep.subr.bf16.mxu0 %v3492_v3 }
  0xc2   :  { %2652 = vmatmul.mubr.f32.vlgmr.msra.gmra.mrb[0].mxu0 %v3893_v7 }
  0xc3   :  { %3138 = vmatpush3.bf16.msra.mxu0 %v3856_v39  ;;  %2686 = vmatprep.mubr.msk.f32.mxu0 %vm3493_vm2, %v3494_v55 }
  0xc4   :  { %3139 = vmatprep.subr.bf16.mxu0 %v3492_v3 }
  0xc7   :  { %3141 = vmatpush3.bf16.msra.mxu0 %v3860_v37 }
  0xc8   :  { %3142 = vmatprep.subr.bf16.mxu0 %v3492_v3 }
  0xcb   :  { %3144 = vmatpush3.bf16.msra.mxu0 %v3864_v38 }
  0xcc   :  { %3145 = vmatprep.subr.bf16.mxu0 %v3492_v3 }
  0xcf   :  { %3147 = vmatpush3.bf16.msra.mxu0 %v3868_v22 }
  0xd0   :  { %3148 = vmatprep.subr.bf16.mxu0 %v3492_v3 }
  0xd3   :  { %3150 = vmatpush3.bf16.msra.mxu0 %v3872_v41 }
  0xd4   :  { %3151 = vmatprep.subr.bf16.mxu0 %v3492_v3 }
  0xd7   :  { %3153 = vmatpush3.bf16.msra.mxu0 %v3876_v44 }
  0xd8   :  { %3154 = vmatprep.subr.bf16.mxu0 %v3492_v3 }
  0xdb   :  { %3156 = vmatpush3.bf16.msra.mxu0 %v3880_v1 }
  0xdc   :  { %3157 = vmatprep.subr.bf16.mxu0 %v3492_v3 }
  0xdf   :  { %3159 = vmatpush3.bf16.msra.mxu0 %v3884_v2 }
  0xe0   :  { %3160 = vmatprep.subr.bf16.mxu0 %v3492_v3 }
  0xe2   :  { %2687 = vmatmul.mubr.f32.vlgmr.msra.gmra.mrb[0].mxu0 %v153_v51 }
  0xe3   :  { %3162 = vmatpush3.bf16.msra.mxu0 %v3566_v17  ;;  %2721 = vmatprep.mubr.msk.f32.mxu0 %vm3493_vm2, %v3494_v55 }
  0xe4   :  { %3163 = vmatprep.subr.bf16.mxu0 %v3492_v3 }
  0xe7   :  { %3165 = vmatpush3.bf16.msra.mxu0 %v3573_v19 }
  0xe8   :  { %3166 = vmatprep.subr.bf16.mxu0 %v3492_v3 }
  0xeb   :  { %3168 = vmatpush3.bf16.msra.mxu0 %v3593_v24 }
  0xec   :  { %3169 = vmatprep.subr.bf16.mxu0 %v3492_v3 }
  0xef   :  { %3171 = vmatpush3.bf16.msra.mxu0 %v3613_v29 }
  0xf0   :  { %3172 = vmatprep.subr.bf16.mxu0 %v3492_v3 }
  0xf3   :  { %3174 = vmatpush3.bf16.msra.mxu0 %v3636_v36 }
  0xf4   :  { %3175 = vmatprep.subr.bf16.mxu0 %v3492_v3 }
  0xf7   :  { %3177 = vmatpush3.bf16.msra.mxu0 %v3658_v43 }
  0xf8   :  { %3178 = vmatprep.subr.bf16.mxu0 %v3492_v3 }
  0xfb   :  { %3180 = vmatpush3.bf16.msra.mxu0 %v3674_v50 }
  0xfc   :  { %3181 = vmatprep.subr.bf16.mxu0 %v3492_v3 }
  0xff   :  { %3183 = vmatpush3.bf16.msra.mxu0 %v3717_v63 }
 0x100   :  { %3184 = vmatprep.subr.bf16.mxu0 %v3492_v3 }
 0x102   :  { %2722 = vmatmul.mubr.f32.vlgmr.msra.gmra.mrb[0].mxu0 %v154_v5  ;;  %v52_v5 = vld [vmem:[%s4243_s2] sm:$0xff] }
 0x103   :  { %3186 = vmatpush3.bf16.msra.mxu0 %v3954_v49  ;;  %2756 = vmatprep.mubr.msk.f32.mxu0 %vm3493_vm2, %v3494_v55  ;;  %v724_v16 = vand.u32 4294901760, %v52_v5 }
 0x104   :  { %3187 = vmatprep.subr.bf16.mxu0 %v3492_v3 }
 0x105   :  { %v4045_v32 = vpack.c.bf16 %v727_v34, %v724_v16 }
 0x107   :  { %3189 = vmatpush3.bf16.msra.mxu0 %v3962_v58  ;;  %3234 = vmatpush3.bf16.msra.mxu1 %v4045_v32 }
 0x108   :  { %3190 = vmatprep.subr.bf16.mxu0 %v3492_v3  ;;  %3235 = vmatprep.subr.bf16.mxu1 %v3492_v3 }
 0x10b   :  { %3192 = vmatpush3.bf16.msra.mxu0 %v3972_v47 }
 0x10c   :  { %3193 = vmatprep.subr.bf16.mxu0 %v3492_v3 }
 0x10f   :  { %3195 = vmatpush3.bf16.msra.mxu0 %v3980_v57 }
 0x110   :  { %3196 = vmatprep.subr.bf16.mxu0 %v3492_v3 }
 0x113   :  { %3198 = vmatpush3.bf16.msra.mxu0 %v3988_v4 }
 0x114   :  { %3199 = vmatprep.subr.bf16.mxu0 %v3492_v3 }
 0x117   :  { %3201 = vmatpush3.bf16.msra.mxu0 %v3996_v12 }
 0x118   :  { %3202 = vmatprep.subr.bf16.mxu0 %v3492_v3 }
 0x11b   :  { %3204 = vmatpush3.bf16.msra.mxu0 %v4004_v15 }
 0x11c   :  { %3205 = vmatprep.subr.bf16.mxu0 %v3492_v3 }
 0x11f   :  { %3207 = vmatpush3.bf16.msra.mxu0 %v4012_v26 }
 0x120   :  { %3208 = vmatprep.subr.bf16.mxu0 %v3492_v3 }
 0x122   :  { %2757 = vmatmul.mubr.f32.vlgmr.msra.gmra.mrb[0].mxu0 %v3893_v7 }
 0x123   :  { %3210 = vmatpush3.bf16.msra.mxu0 %v3566_v17  ;;  %2791 = vmatprep.mubr.msk.f32.mxu0 %vm3493_vm2, %v3494_v55 }
 0x124   :  { %3211 = vmatprep.subr.bf16.mxu0 %v3492_v3 }
 0x127   :  { %3213 = vmatpush3.bf16.msra.mxu0 %v3573_v19 }
 0x128   :  { %3214 = vmatprep.subr.bf16.mxu0 %v3492_v3 }
 0x12b   :  { %3216 = vmatpush3.bf16.msra.mxu0 %v3593_v24 }
 0x12c   :  { %3217 = vmatprep.subr.bf16.mxu0 %v3492_v3 }
 0x12f   :  { %3219 = vmatpush3.bf16.msra.mxu0 %v3613_v29 }
 0x130   :  { %3220 = vmatprep.subr.bf16.mxu0 %v3492_v3 }
 0x133   :  { %3222 = vmatpush3.bf16.msra.mxu0 %v3636_v36 }
 0x134   :  { %3223 = vmatprep.subr.bf16.mxu0 %v3492_v3 }
 0x137   :  { %3225 = vmatpush3.bf16.msra.mxu0 %v3658_v43 }
 0x138   :  { %3226 = vmatprep.subr.bf16.mxu0 %v3492_v3 }
 0x13b   :  { %3228 = vmatpush3.bf16.msra.mxu0 %v3674_v50 }
 0x13c   :  { %3229 = vmatprep.subr.bf16.mxu0 %v3492_v3 }
 0x13f   :  { %3231 = vmatpush3.bf16.msra.mxu0 %v3717_v63 }
 0x140   :  { %3394 = vmatprep.subr.bf16.mxu0 %v3492_v3 }
 0x142   :  { %2792 = vmatmul.mubr.f32.vlgmr.msra.gmra.mrb[0].mxu0 %v3893_v7  ;;  %v802_v7 = vsub.f32 %v52_v5, %v724_v16 }
 0x143   :  { %3050 = vmatprep.mubr.msk.f32.mxu0 %vm3493_vm2, %v3494_v55  ;;  %3396 = vmatpush3.bf16.msra.mxu0 %v4045_v32 }
 0x144   :  { %3397 = vmatprep.subr.bf16.mxu0 %v3492_v3  ;;  %v803_v46 = vand.u32 4294901760, %v802_v7  ;;  %v4053_v54 = vpack.c.bf16 %v809_v33, %v802_v7 }
 0x146   :  { %v804_v42 = vsub.f32 %v802_v7, %v803_v46  ;;  %v4055_v51 = vpack.c.bf16 %v810_v59, %v803_v46 }
 0x148   :  { %v805_v27 = vand.u32 4294901760, %v804_v42 }
 0x14a   :  { %v4051_v52 = vpack.c.bf16 %v812_v30, %v805_v27 }
 0x215   :  { %v708_v48 = vpop.f32.mrb[0].mxu0 }
 0x216   :  { %v4058_v56 = vsub.f32 %v3529_v0, %v708_v48  ;;  %v2793_v60 = vpop.f32.mrb[1].mxu0  ;;  %v4091_v0 = vand.u32 4294901760, %v3641_v40 }
 0x218   :  { %v713_v62 = vmul.f32 1.442695, %v4058_v56  ;;  %v4097_v28 = vsub.f32 %v3641_v40, %v4091_v0 }
 0x21a   :  { %3463 = vpow2.f32 %v713_v62  ;;  %v1267_v31 = vand.u32 4294901760, %v4097_v28 }
 0x21c   :  { %v1268_v16 = vsub.f32 %v4097_v28, %v1267_v31 }
 0x21e   :  { %v1269_v34 = vand.u32 4294901760, %v1268_v16 }
 0x224   :  { %v3464_v6 = vpop.eup %3463 }
 0x225   :  { %v717_v10 = vsel %vm715_vm7, %v3464_v6, 0 }
 0x226   :  { %v790_v18 = vand.u32 4294901760, %v717_v10 }
 0x228   :  { %v791_v14 = vsub.f32 %v717_v10, %v790_v18 }
 0x22a   :  { %v792_v21 = vand.u32 4294901760, %v791_v14 }
 0x22c   :  { %v793_v25 = vsub.f32 %v791_v14, %v792_v21 }
 0x22e   :  { %v794_v5 = vand.u32 4294901760, %v793_v25 }
 0x230   :  { %2799 = vmatmul.mubr.f32.vlgmr.msra.gmra.mrb[0].mxu1 %v794_v5 }
 0x231   :  { %3237 = vmatpush3.bf16.msra.mxu1 %v4051_v52  ;;  %2805 = vmatprep.mubr.msk.f32.mxu1 %vm3493_vm2, %v3494_v55 }
 0x232   :  { %3238 = vmatprep.subr.bf16.mxu1 %v3492_v3 }
 0x238   :  { %2806 = vmatmul.mubr.f32.vlgmr.msra.gmra.mrb[0].mxu1 %v790_v18 }
 0x239   :  { %3240 = vmatpush3.bf16.msra.mxu1 %v4053_v54  ;;  %2812 = vmatprep.mubr.msk.f32.mxu1 %vm3493_vm2, %v3494_v55 }
 0x23a   :  { %3241 = vmatprep.subr.bf16.mxu1 %v3492_v3 }
 0x240   :  { %2813 = vmatmul.mubr.f32.vlgmr.msra.gmra.mrb[0].mxu1 %v791_v14 }
 0x241   :  { %3243 = vmatpush3.bf16.msra.mxu1 %v4045_v32  ;;  %2819 = vmatprep.mubr.msk.f32.mxu1 %vm3493_vm2, %v3494_v55 }
 0x242   :  { %3244 = vmatprep.subr.bf16.mxu1 %v3492_v3 }
 0x248   :  { %2820 = vmatmul.mubr.f32.vlgmr.msra.gmra.mrb[0].mxu1 %v792_v21 }
 0x249   :  { %3246 = vmatpush3.bf16.msra.mxu1 %v4055_v51  ;;  %2826 = vmatprep.mubr.msk.f32.mxu1 %vm3493_vm2, %v3494_v55 }
 0x24a   :  { %3247 = vmatprep.subr.bf16.mxu1 %v3492_v3 }
 0x250   :  { %2827 = vmatmul.mubr.f32.vlgmr.msra.gmra.mrb[0].mxu1 %v790_v18 }
 0x251   :  { %3249 = vmatpush3.bf16.msra.mxu1 %v4045_v32  ;;  %2833 = vmatprep.mubr.msk.f32.mxu1 %vm3493_vm2, %v3494_v55 }
 0x252   :  { %3250 = vmatprep.subr.bf16.mxu1 %v3492_v3 }
 0x258   :  { %2834 = vmatmul.mubr.f32.vlgmr.msra.gmra.mrb[0].mxu1 %v790_v18 }
 0x259   :  { %3252 = vmatpush3.bf16.msra.mxu1 %v3566_v17  ;;  %2868 = vmatprep.mubr.msk.f32.mxu1 %vm3493_vm2, %v3494_v55 }
 0x25a   :  { %3253 = vmatprep.subr.bf16.mxu1 %v3492_v3 }
 0x25d   :  { %3255 = vmatpush3.bf16.msra.mxu1 %v3573_v19 }
 0x25e   :  { %3256 = vmatprep.subr.bf16.mxu1 %v3492_v3 }
 0x261   :  { %3258 = vmatpush3.bf16.msra.mxu1 %v3593_v24 }
 0x262   :  { %3259 = vmatprep.subr.bf16.mxu1 %v3492_v3 }
 0x265   :  { %3261 = vmatpush3.bf16.msra.mxu1 %v3613_v29 }
 0x266   :  { %3262 = vmatprep.subr.bf16.mxu1 %v3492_v3 }
 0x269   :  { %3264 = vmatpush3.bf16.msra.mxu1 %v3636_v36 }
 0x26a   :  { %3265 = vmatprep.subr.bf16.mxu1 %v3492_v3 }
 0x26d   :  { %3267 = vmatpush3.bf16.msra.mxu1 %v3658_v43 }
 0x26e   :  { %3268 = vmatprep.subr.bf16.mxu1 %v3492_v3 }
 0x271   :  { %3270 = vmatpush3.bf16.msra.mxu1 %v3674_v50 }
 0x272   :  { %3271 = vmatprep.subr.bf16.mxu1 %v3492_v3 }
 0x275   :  { %3273 = vmatpush3.bf16.msra.mxu1 %v3717_v63 }
 0x276   :  { %3274 = vmatprep.subr.bf16.mxu1 %v3492_v3 }
 0x278   :  { %2869 = vmatmul.mubr.f32.vlgmr.msra.gmra.mrb[2].mxu1 %v1269_v34 }
 0x279   :  { %3276 = vmatpush3.bf16.msra.mxu1 %v3722_v8  ;;  %2903 = vmatprep.mubr.msk.f32.mxu1 %vm3493_vm2, %v3494_v55 }
 0x27a   :  { %3277 = vmatprep.subr.bf16.mxu1 %v3492_v3 }
 0x27d   :  { %3279 = vmatpush3.bf16.msra.mxu1 %v3757_v35 }
 0x27e   :  { %3280 = vmatprep.subr.bf16.mxu1 %v3492_v3 }
 0x281   :  { %3282 = vmatpush3.bf16.msra.mxu1 %v3780_v61 }
 0x282   :  { %3283 = vmatprep.subr.bf16.mxu1 %v3492_v3 }
 0x285   :  { %3285 = vmatpush3.bf16.msra.mxu1 %v3784_v9 }
 0x286   :  { %3286 = vmatprep.subr.bf16.mxu1 %v3492_v3 }
 0x289   :  { %3288 = vmatpush3.bf16.msra.mxu1 %v3804_v20 }
 0x28a   :  { %3289 = vmatprep.subr.bf16.mxu1 %v3492_v3 }
 0x28d   :  { %3291 = vmatpush3.bf16.msra.mxu1 %v3840_v23 }
 0x28e   :  { %3292 = vmatprep.subr.bf16.mxu1 %v3492_v3 }
 0x291   :  { %3294 = vmatpush3.bf16.msra.mxu1 %v3844_v11 }
 0x292   :  { %3295 = vmatprep.subr.bf16.mxu1 %v3492_v3 }
 0x295   :  { %3297 = vmatpush3.bf16.msra.mxu1 %v3852_v13 }
 0x296   :  { %3298 = vmatprep.subr.bf16.mxu1 %v3492_v3 }
 0x298   :  { %2904 = vmatmul.mubr.f32.vlgmr.msra.gmra.mrb[2].mxu1 %v4091_v0 }
 0x299   :  { %3300 = vmatpush3.bf16.msra.mxu1 %v3856_v39  ;;  %2938 = vmatprep.mubr.msk.f32.mxu1 %vm3493_vm2, %v3494_v55 }
 0x29a   :  { %3301 = vmatprep.subr.bf16.mxu1 %v3492_v3 }
 0x29d   :  { %3303 = vmatpush3.bf16.msra.mxu1 %v3860_v37 }
 0x29e   :  { %3304 = vmatprep.subr.bf16.mxu1 %v3492_v3 }
 0x2a1   :  { %3306 = vmatpush3.bf16.msra.mxu1 %v3864_v38  ;;  %v2316_v38 = vpop.permute.xlu1 %2315 }
 0x2a2   :  { %3307 = vmatprep.subr.bf16.mxu1 %v3492_v3 }
 0x2a5   :  { %3309 = vmatpush3.bf16.msra.mxu1 %v3868_v22 }
 0x2a6   :  { %3310 = vmatprep.subr.bf16.mxu1 %v3492_v3 }
 0x2a9   :  { %3312 = vmatpush3.bf16.msra.mxu1 %v3872_v41 }
 0x2aa   :  { %3313 = vmatprep.subr.bf16.mxu1 %v3492_v3 }
 0x2ad   :  { %3315 = vmatpush3.bf16.msra.mxu1 %v3876_v44 }
 0x2ae   :  { %3316 = vmatprep.subr.bf16.mxu1 %v3492_v3 }
 0x2b1   :  { %3318 = vmatpush3.bf16.msra.mxu1 %v3880_v1 }
 0x2b2   :  { %3319 = vmatprep.subr.bf16.mxu1 %v3492_v3 }
 0x2b5   :  { %3321 = vmatpush3.bf16.msra.mxu1 %v3884_v2 }
 0x2b6   :  { %3322 = vmatprep.subr.bf16.mxu1 %v3492_v3 }
 0x2b8   :  { %2939 = vmatmul.mubr.f32.vlgmr.msra.gmra.mrb[2].mxu1 %v4097_v28 }
 0x2b9   :  { %3324 = vmatpush3.bf16.msra.mxu1 %v3566_v17  ;;  %2973 = vmatprep.mubr.msk.f32.mxu1 %vm3493_vm2, %v3494_v55 }
 0x2ba   :  { %3325 = vmatprep.subr.bf16.mxu1 %v3492_v3 }
 0x2bd   :  { %3327 = vmatpush3.bf16.msra.mxu1 %v3573_v19 }
 0x2be   :  { %3328 = vmatprep.subr.bf16.mxu1 %v3492_v3 }
 0x2c1   :  { %3330 = vmatpush3.bf16.msra.mxu1 %v3593_v24 }
 0x2c2   :  { %3331 = vmatprep.subr.bf16.mxu1 %v3492_v3 }
 0x2c5   :  { %3333 = vmatpush3.bf16.msra.mxu1 %v3613_v29 }
 0x2c6   :  { %3334 = vmatprep.subr.bf16.mxu1 %v3492_v3 }
 0x2c9   :  { %3336 = vmatpush3.bf16.msra.mxu1 %v3636_v36 }
 0x2ca   :  { %3337 = vmatprep.subr.bf16.mxu1 %v3492_v3 }
 0x2cd   :  { %3339 = vmatpush3.bf16.msra.mxu1 %v3658_v43 }
 0x2ce   :  { %3340 = vmatprep.subr.bf16.mxu1 %v3492_v3 }
 0x2d1   :  { %3342 = vmatpush3.bf16.msra.mxu1 %v3674_v50 }
 0x2d2   :  { %3343 = vmatprep.subr.bf16.mxu1 %v3492_v3 }
 0x2d5   :  { %3345 = vmatpush3.bf16.msra.mxu1 %v3717_v63 }
 0x2d6   :  { %3346 = vmatprep.subr.bf16.mxu1 %v3492_v3 }
 0x2d8   :  { %2974 = vmatmul.mubr.f32.vlgmr.msra.gmra.mrb[2].mxu1 %v1267_v31 }
 0x2d9   :  { %3348 = vmatpush3.bf16.msra.mxu1 %v3954_v49  ;;  %3008 = vmatprep.mubr.msk.f32.mxu1 %vm3493_vm2, %v3494_v55 }
 0x2da   :  { %3349 = vmatprep.subr.bf16.mxu1 %v3492_v3 }
 0x2dd   :  { %3351 = vmatpush3.bf16.msra.mxu1 %v3962_v58 }
 0x2de   :  { %3352 = vmatprep.subr.bf16.mxu1 %v3492_v3 }
 0x2e1   :  { %3354 = vmatpush3.bf16.msra.mxu1 %v3972_v47 }
 0x2e2   :  { %3355 = vmatprep.subr.bf16.mxu1 %v3492_v3 }
 0x2e5   :  { %3357 = vmatpush3.bf16.msra.mxu1 %v3980_v57 }
 0x2e6   :  { %3358 = vmatprep.subr.bf16.mxu1 %v3492_v3 }
 0x2e9   :  { %3360 = vmatpush3.bf16.msra.mxu1 %v3988_v4 }
 0x2ea   :  { %3361 = vmatprep.subr.bf16.mxu1 %v3492_v3 }
 0x2ed   :  { %3363 = vmatpush3.bf16.msra.mxu1 %v3996_v12 }
 0x2ee   :  { %3364 = vmatprep.subr.bf16.mxu1 %v3492_v3 }
 0x2f1   :  { %3366 = vmatpush3.bf16.msra.mxu1 %v4004_v15 }
 0x2f2   :  { %3367 = vmatprep.subr.bf16.mxu1 %v3492_v3 }
 0x2f5   :  { %3369 = vmatpush3.bf16.msra.mxu1 %v4012_v26 }
 0x2f6   :  { %3370 = vmatprep.subr.bf16.mxu1 %v3492_v3 }
 0x2f8   :  { %3009 = vmatmul.mubr.f32.vlgmr.msra.gmra.mrb[2].mxu1 %v4091_v0 }
 0x2f9   :  { %3372 = vmatpush3.bf16.msra.mxu1 %v3566_v17  ;;  %3043 = vmatprep.mubr.msk.f32.mxu1 %vm3493_vm2, %v3494_v55 }
 0x2fa   :  { %3373 = vmatprep.subr.bf16.mxu1 %v3492_v3 }
 0x2fd   :  { %3375 = vmatpush3.bf16.msra.mxu1 %v3573_v19 }
 0x2fe   :  { %3376 = vmatprep.subr.bf16.mxu1 %v3492_v3 }
 0x301   :  { %3378 = vmatpush3.bf16.msra.mxu1 %v3593_v24  ;;  %v2343_v24 = vld [vmem:[%s4245_s4] ss:$0 sm:$0xff]  ;;  %s3495_s4 = smov [#allocation2]  }
 0x302   :  { %3379 = vmatprep.subr.bf16.mxu1 %v3492_v3  ;;  %s2335_s30 = sshll.u32 %s3495_s4, 4  ;;  %s2336_s30 = int_to_ptr.vmem [resolvable:$true] %s2335_s30 }
 0x303   :  { %s3467_s6 = scalar_lea.vmem %s2336_s30, 16  ;;  %s3471_s7 = scalar_lea.vmem %s2336_s30, 32 }
 0x304   :  { %p3468_p0 = scmp.ne.s32.totalorder %s2336_s30, %s3467_s6  ;;  %p3472_p1 = scmp.lt.s32.totalorder %s2336_s30, %s2336_s30 }
 0x305   :  { %3381 = vmatpush3.bf16.msra.mxu1 %v3613_v29  ;;  %p3473_p2 = scmp.lt.s32.totalorder %s3471_s7, %s3467_s6 }
 0x306   :  { %3382 = vmatprep.subr.bf16.mxu1 %v3492_v3 }
 0x307   :  { %p3474_p3 = por %p3473_p2, %p3472_p1 }
 0x309   :  { %3384 = vmatpush3.bf16.msra.mxu1 %v3636_v36  ;;  %p3475_p4 = pnand %p3474_p3, %p3468_p0 }
 0x30a   :  { %3385 = vmatprep.subr.bf16.mxu1 %v3492_v3 }
 0x30d   :  { %3387 = vmatpush3.bf16.msra.mxu1 %v3658_v43 }
 0x30e   :  { %3388 = vmatprep.subr.bf16.mxu1 %v3492_v3 }
 0x311   :  { %3390 = vmatpush3.bf16.msra.mxu1 %v3674_v50 }
 0x312   :  { %3391 = vmatprep.subr.bf16.mxu1 %v3492_v3 }
 0x315   :  { %3393 = vmatpush3.bf16.msra.mxu1 %v3717_v63 }
 0x318   :  { %3044 = vmatmul.mubr.f32.vlgmr.msra.gmra.mrb[2].mxu1 %v4091_v0 }
 0x32b   :  { %v1178_v17 = vpop.f32.mrb[0].mxu1 }
 0x32c   :  { %v2835_v19 = vpop.f32.mrb[1].mxu1  ;;  %3465 = vlog2.f32 %v1178_v17 }
 0x336   :  { %v3466_v23 = vpop.eup %3465 }
 0x337   :  { %v2298_v11 = vmul.f32 0.6931472, %v3466_v23 }
 0x3eb   :  { %v1821_v29 = vpop.f32.mrb[2].mxu1 }
 0x3ec   :  { %v1831_v36 = vsub.f32 %v1821_v29, %v2343_v24  ;;  %v3045_v40 = vpop.f32.mrb[3].mxu1 }
 0x3ee   :  { %v1832_v43 = vand.u32 2147483647, %v1831_v36 }
 0x3f0   :  { %vm1833_vm8 = vcmp.lt.f32.partialorder %v1832_v43, 0.5 }
 0x3f1   :  { %v1834_v8 = vsel %vm1833_vm8, %v4058_v56, 0.0 }
 0x3f2   :  { %v1836_v50 = vsel %vm715_vm7, %v1834_v8, 0 }
 0x3f3   :  { %v1905_v35 = vand.u32 4294901760, %v1836_v50 }
 0x3f5   :  { %v1906_v61 = vsub.f32 %v1836_v50, %v1905_v35 }
 0x3f7   :  { %v1907_v63 = vand.u32 4294901760, %v1906_v61 }
 0x3f9   :  { %v1908_v9 = vsub.f32 %v1906_v61, %v1907_v63 }
 0x3fb   :  { %v1909_v20 = vand.u32 4294901760, %v1908_v9 }
 0x3fd   :  { %3051 = vmatmul.mubr.f32.vlgmr.msra.gmra.mrb[2].mxu0 %v1909_v20 }
 0x3fe   :  { %3399 = vmatpush3.bf16.msra.mxu0 %v4051_v52  ;;  %3057 = vmatprep.mubr.msk.f32.mxu0 %vm3493_vm2, %v3494_v55 }
 0x3ff   :  { %3400 = vmatprep.subr.bf16.mxu0 %v3492_v3 }
 0x405   :  { %3058 = vmatmul.mubr.f32.vlgmr.msra.gmra.mrb[2].mxu0 %v1905_v35 }
 0x406   :  { %3402 = vmatpush3.bf16.msra.mxu0 %v4053_v54  ;;  %3064 = vmatprep.mubr.msk.f32.mxu0 %vm3493_vm2, %v3494_v55 }
 0x407   :  { %3403 = vmatprep.subr.bf16.mxu0 %v3492_v3 }
 0x40d   :  { %3065 = vmatmul.mubr.f32.vlgmr.msra.gmra.mrb[2].mxu0 %v1906_v61 }
 0x40e   :  { %3405 = vmatpush3.bf16.msra.mxu0 %v4045_v32  ;;  %3071 = vmatprep.mubr.msk.f32.mxu0 %vm3493_vm2, %v3494_v55 }
 0x40f   :  { %3406 = vmatprep.subr.bf16.mxu0 %v3492_v3 }
 0x415   :  { %3072 = vmatmul.mubr.f32.vlgmr.msra.gmra.mrb[2].mxu0 %v1907_v63 }
 0x416   :  { %3408 = vmatpush3.bf16.msra.mxu0 %v4055_v51  ;;  %3078 = vmatprep.mubr.msk.f32.mxu0 %vm3493_vm2, %v3494_v55 }
 0x417   :  { %3409 = vmatprep.subr.bf16.mxu0 %v3492_v3 }
 0x41d   :  { %3079 = vmatmul.mubr.f32.vlgmr.msra.gmra.mrb[2].mxu0 %v1905_v35 }
 0x41e   :  { %3411 = vmatpush3.bf16.msra.mxu0 %v4045_v32  ;;  %3085 = vmatprep.mubr.msk.f32.mxu0 %vm3493_vm2, %v3494_v55 }
 0x425   :  { %3086 = vmatmul.mubr.f32.vlgmr.msra.gmra.mrb[2].mxu0 %v1905_v35 }
 0x4f8   :  { %v2293_v13 = vpop.f32.mrb[2].mxu0 }
 0x4f9   :  { %v2299_v39 = vsub.f32 %v2298_v11, %v2293_v13  ;;  %v3087_v37 = vpop.f32.mrb[3].mxu0 }
 0x4fb   :  { %v2301_v22 = vsel %vm2300_vm9, %v2299_v39, 0.0 }
 0x4fc   :  { %v2318_v3 = vsel %vm30_vm3, %v2316_v38, %v2301_v22 }
 0x4fd   :  { %v2322_v41 = vrot.slane %v2318_v3, 4 }
 0x4ff   :  { %v2323_v44 = vadd.f32 %v2322_v41, %v2318_v3 }
 0x501   :  { %v2324_v1 = vrot.slane %v2323_v44, 2 }
 0x503   :  { %v2325_v2 = vadd.f32 %v2324_v1, %v2323_v44 }
 0x505   :  { %v2326_v55 = vrot.slane %v2325_v2, 1 }
 0x507   :  { %v2327_v49 = vadd.f32 %v2326_v55, %v2325_v2 }
 0x509   :  { %2328 = vst [vmem:[#allocation2] sm:$0x1] %v2327_v49 }
 0x50a   :  { %3478 = shalt.err (!%p3475_p4)
}
 0x50b   :  { %s3479_s10 = scalar_lea.hbm %s4246_s5, 16 }
 0x50c   :  { %p3480_p5 = scmp.ne.s32.totalorder %s4246_s5, %s3479_s10  ;;  %p3483_p6 = scmp.lt.u32.totalorder %s3479_s10, %s4246_s5 }
 0x50e   :  { %p3485_p7 = pnand %p3483_p6, %p3480_p5 }
 0x510   :  { %3488 = shalt.err (!%p3485_p7)
}
 0x511   :  { %2338 = dma.vmem_to_hbm [thread:$0]  %s2336_s30, 16, %s4246_s5, [#allocation3]  }
 0x512   :  { %3489 = dma.done.wait [#allocation3], 16  }
 0x513   :  { %3490 = vsyncadd [#allocation3], 4294967280 }
 0x514   :  { %2342 = vsyncpa [#allocation3], 1 }

</bundles_post_ra>
